<compile_context>
chip_gen: v7x
topology: tpu7x:2x2x1
jax: 0.10.0
libtpu: 0.0.40
codegen_flags: <defaults>
</compile_context>

<pallas_src>
import functools

import jax
import jax.numpy as jnp
from jax.experimental import pallas as pl
from jax.experimental.pallas import tpu as pltpu


def _highway_kernel(x_ref, w_ref, b_ref, bits_ref, o_ref, *, embed, keep_prob):
    x = x_ref[...]                                                    # (TB, E) f32

    # One fused matmul: [proj | gate] = x @ [Wp | Wg] + [bp | bg]
    y = jnp.dot(x.astype(w_ref.dtype), w_ref[...],
                preferred_element_type=jnp.float32) + b_ref[...]      # (TB, 2E) f32

    proj = jnp.maximum(y[:, :embed], 0.0)                             # relu branch
    gate = jax.nn.sigmoid(y[:, embed:])                               # gate branch

    # x_highway = gate*proj + (1-gate)*x  ==  x + gate*(proj - x)
    hw = x + gate * (proj - x)

    # Dropout (training semantics, inverted scaling). Static no-op if keep==1.
    if keep_prob < 1.0:
        thresh = jnp.uint32(int(keep_prob * 4294967296.0))            # keep_prob * 2^32
        keep = bits_ref[...] < thresh                                 # uint32 compare
        hw = jnp.where(keep, hw * (1.0 / keep_prob), 0.0)

    o_ref[...] = hw.astype(o_ref.dtype)


def highway(x, w_proj, b_proj, w_gate, b_gate, *, dropout_rate=0.3, rng_key=None):
    """x: (B, E) float32. w_*: (E, E) stored as x @ W (transpose of nn.Linear
    weight). b_*: (1, E)."""
    B, E = x.shape
    keep_prob = 1.0 - float(dropout_rate)

    # Fuse the two linear layers into one (E, 2E) bf16 weight + (1, 2E) f32 bias.
    w_cat = jnp.concatenate([w_proj, w_gate], axis=1).astype(jnp.bfloat16)
    b_cat = jnp.concatenate([b_proj, b_gate], axis=1).astype(jnp.float32)

    # Dropout random bits generated host-side (distinct per element / per tile).
    if keep_prob < 1.0:
        if rng_key is None:
            rng_key = jax.random.PRNGKey(0)
        bits = jax.random.bits(rng_key, (B, E), dtype=jnp.uint32)
    else:
        bits = jnp.zeros((B, E), dtype=jnp.uint32)

    # Batch tiling: big tiles where possible, full-batch block otherwise.
    if B > 512 and B % 512 == 0:
        tb = 512
    else:
        tb = B
    grid = (B // tb,)

    kernel = functools.partial(_highway_kernel, embed=E, keep_prob=keep_prob)

    return pl.pallas_call(
        kernel,
        out_shape=jax.ShapeDtypeStruct((B, E), x.dtype),
        grid_spec=pltpu.PrefetchScalarGridSpec(
            num_scalar_prefetch=0,
            grid=grid,
            in_specs=[
                pl.BlockSpec((tb, E), lambda i: (i, 0)),      # x       (tiled)
                pl.BlockSpec((E, 2 * E), lambda i: (0, 0)),   # W_cat   (resident)
                pl.BlockSpec((1, 2 * E), lambda i: (0, 0)),   # b_cat   (resident)
                pl.BlockSpec((tb, E), lambda i: (i, 0)),      # dropout bits (tiled)
            ],
            out_specs=pl.BlockSpec((tb, E), lambda i: (i, 0)),
        ),
        compiler_params=pltpu.CompilerParams(
            dimension_semantics=("parallel",),                # shard batch tiles on v7x
            vmem_limit_bytes=64 << 20,
        ),
    )(x, w_cat, b_cat, bits)


def _init_params(key, embed_size):
    """nn.Linear default init U[-1/sqrt(E), 1/sqrt(E)] plus bias.fill_(-0.1)."""
    k1, k2 = jax.random.split(key)
    bound = 1.0 / (embed_size ** 0.5)
    w_proj = jax.random.uniform(k1, (embed_size, embed_size), jnp.float32,
                                -bound, bound)
    w_gate = jax.random.uniform(k2, (embed_size, embed_size), jnp.float32,
                                -bound, bound)
    b_proj = jnp.full((1, embed_size), -0.1, jnp.float32)
    b_gate = jnp.full((1, embed_size), -0.1, jnp.float32)
    return w_proj, b_proj, w_gate, b_gate


def _highway_ref_no_dropout(x, w_proj, b_proj, w_gate, b_gate):
    """Reference with the same bf16-matmul / f32-accumulate numerics."""
    xb = x.astype(jnp.bfloat16)
    proj = jax.nn.relu(
        jnp.dot(xb, w_proj.astype(jnp.bfloat16),
                preferred_element_type=jnp.float32) + b_proj)
    gate = jax.nn.sigmoid(
        jnp.dot(xb, w_gate.astype(jnp.bfloat16),
                preferred_element_type=jnp.float32) + b_gate)
    return x + gate * (proj - x)


if __name__ == "__main__":
    batch_size, embed_size = 8, 128          # lane-dense E (multiple of 128)
    key = jax.random.PRNGKey(0)
    kx, kp, kd = jax.random.split(key, 3)

    x = jax.random.normal(kx, (batch_size, embed_size), jnp.float32)
    w_proj, b_proj, w_gate, b_gate = _init_params(kp, embed_size)

    # 1) Correctness of the hot path (dropout disabled -> identity).
    out_eval = highway(x, w_proj, b_proj, w_gate, b_gate, dropout_rate=0.0)
    out_eval = jax.block_until_ready(out_eval)
    ref = _highway_ref_no_dropout(x, w_proj, b_proj, w_gate, b_gate)
    assert jnp.allclose(out_eval, ref, atol=2e-3, rtol=2e-3), "mismatch vs ref"

    # 2) Training-mode run with dropout (p=0.3).
    out_train = highway(x, w_proj, b_proj, w_gate, b_gate,
                        dropout_rate=0.3, rng_key=kd)
    out_train = jax.block_until_ready(out_train)
    assert out_train.shape == (batch_size, embed_size)
    assert bool(jnp.all(jnp.isfinite(out_train)))

    print("KERNEL_OK")
</pallas_src>

<mosaic_0001>
module attributes {stable_mosaic.version = 11 : i64} {
  func.func @_highway_kernel(%arg0: i32, %arg1: memref<8x128xf32, #tpu.memory_space<vmem>>, %arg2: memref<128x256xbf16, #tpu.memory_space<vmem>>, %arg3: memref<1x256xf32, #tpu.memory_space<vmem>>, %arg4: memref<8x128xi32, #tpu.memory_space<vmem>>, %arg5: memref<8x128xf32, #tpu.memory_space<vmem>>) attributes {dimension_semantics = [#tpu.dimension_semantics<parallel>], iteration_bounds = array<i64: 1>, scalar_prefetch = 0 : i64, scratch_operands = 0 : i64, tpu.core_type = #tpu.core_type<tc>, window_params = [{transform_indices = @transform_0, window_bounds = array<i64: 8, 128>}, {pipeline_mode = #tpu.pipeline_mode<synchronous>, transform_indices = @transform_1, window_bounds = array<i64: 128, 256>}, {pipeline_mode = #tpu.pipeline_mode<synchronous>, transform_indices = @transform_2, window_bounds = array<i64: 1, 256>}, {transform_indices = @transform_3, window_bounds = array<i64: 8, 128>}, {transform_indices = @transform_4, window_bounds = array<i64: 8, 128>}]} {
    %c0 = arith.constant 0 : index
    %c0_0 = arith.constant 0 : index
    %0 = vector.load %arg1[%c0, %c0_0] : memref<8x128xf32, #tpu.memory_space<vmem>>, vector<8x128xf32>
    %1 = arith.truncf %0 : vector<8x128xf32> to vector<8x128xbf16>
    %c0_1 = arith.constant 0 : index
    %c0_2 = arith.constant 0 : index
    %2 = vector.load %arg2[%c0_1, %c0_2] : memref<128x256xbf16, #tpu.memory_space<vmem>>, vector<128x256xbf16>
    %cst = arith.constant dense<0.000000e+00> : vector<8x256xf32>
    %3 = tpu.matmul %1, %2, %cst {dimension_numbers = #tpu.dot_dimension_numbers<[1], [0], [0], [1], [0, 0, 1, 1], [], []>} : vector<8x128xbf16>, vector<128x256xbf16>, vector<8x256xf32> -> vector<8x256xf32>
    %c0_3 = arith.constant 0 : index
    %c0_4 = arith.constant 0 : index
    %4 = vector.load %arg3[%c0_3, %c0_4] : memref<1x256xf32, #tpu.memory_space<vmem>>, vector<1x256xf32>
    %5 = vector.broadcast %4 : vector<1x256xf32> to vector<8x256xf32>
    %6 = arith.addf %3, %5 : vector<8x256xf32>
    %7 = vector.extract_strided_slice %6 {offsets = [0, 0], sizes = [8, 128], strides = [1, 1]} : vector<8x256xf32> to vector<8x128xf32>
    %cst_5 = arith.constant 0.000000e+00 : f32
    %8 = vector.broadcast %cst_5 : f32 to vector<8x128xf32>
    %9 = arith.maximumf %7, %8 : vector<8x128xf32>
    %10 = vector.extract_strided_slice %6 {offsets = [0, 128], sizes = [8, 128], strides = [1, 1]} : vector<8x256xf32> to vector<8x128xf32>
    %11 = arith.negf %10 : vector<8x128xf32>
    %12 = math.exp %11 : vector<8x128xf32>
    %cst_6 = arith.constant 1.000000e+00 : f32
    %13 = vector.broadcast %cst_6 : f32 to vector<8x128xf32>
    %14 = arith.addf %13, %12 : vector<8x128xf32>
    %15 = arith.divf %13, %14 : vector<8x128xf32>
    %16 = arith.subf %9, %0 : vector<8x128xf32>
    %17 = arith.mulf %15, %16 : vector<8x128xf32>
    %18 = arith.addf %0, %17 : vector<8x128xf32>
    %c0_7 = arith.constant 0 : index
    %c0_8 = arith.constant 0 : index
    %19 = vector.load %arg5[%c0_7, %c0_8] : memref<8x128xf32, #tpu.memory_space<vmem>>, vector<8x128xf32>
    tpu.vector_store %arg5[%c0_7, %c0_8], %18 {strides = array<i32>} : memref<8x128xf32, #tpu.memory_space<vmem>>, vector<8x128xf32>,
    return
  }
  func.func @transform_0(%arg0: i32) -> (i32, i32) {
    %c0_i32 = arith.constant 0 : i32
    %c0_i32_0 = arith.constant 0 : i32
    return %arg0, %c0_i32 : i32, i32
  }
  func.func @transform_1(%arg0: i32) -> (i32, i32) {
    %c0_i32 = arith.constant 0 : i32
    %c0_i32_0 = arith.constant 0 : i32
    %c0_i32_1 = arith.constant 0 : i32
    return %c0_i32, %c0_i32_0 : i32, i32
  }
  func.func @transform_2(%arg0: i32) -> (i32, i32) {
    %c0_i32 = arith.constant 0 : i32
    %c0_i32_0 = arith.constant 0 : i32
    %c0_i32_1 = arith.constant 0 : i32
    return %c0_i32, %c0_i32_0 : i32, i32
  }
  func.func @transform_3(%arg0: i32) -> (i32, i32) {
    %c0_i32 = arith.constant 0 : i32
    %c0_i32_0 = arith.constant 0 : i32
    return %arg0, %c0_i32 : i32, i32
  }
  func.func @transform_4(%arg0: i32) -> (i32, i32) {
    %c0_i32 = arith.constant 0 : i32
    %c0_i32_0 = arith.constant 0 : i32
    return %arg0, %c0_i32 : i32, i32
  }
}

</mosaic_0001>

<bundles_post_ra>
// kernel: tpu_custom_call.1
= control target key start
LH: loop header
LB: loop body
LE: loop exit
PB: predicated region body
PF: predicated region fallthrough
CT: control target
= control target key end

     0   :  { %9 = vsyncpa [#allocation3], 0  ;;  %s511_s0 = inlined_call_operand.hbm [shape: f32[8,128], index: 0, kind: input, shape index: {}]   ;;  %s512_s1 = inlined_call_operand.hbm [shape: bf16[128,256], index: 1, kind: input, shape index: {}]   ;;  %s513_s2 = inlined_call_operand.hbm [shape: f32[1,256], index: 2, kind: input, shape index: {}]   ;;  %s514_s3 = inlined_call_operand.hbm [shape: u32[8,128], index: 3, kind: input, shape index: {}]   ;;  %s515_s4 = inlined_call_operand.hbm [shape: f32[8,128], index: 4, kind: output, shape index: {}]  }
   0x1   :  { %10 = vsyncpa [#allocation6], 0 }
   0x2   :  { %11 = vsyncpa [#allocation9], 0 }
   0x3   :  { %12 = vsyncpa [#allocation4], 0  ;;  %s418_s15 = smov [#allocation5]   ;;  %s300_s19 = scalar_lea.hbm %s512_s1, 2048 }
   0x4   :  { %s28_s16 = sshll.u32 %s418_s15, 4  ;;  %p301_p0 = scmp.ne.s32.totalorder %s512_s1, %s300_s19  ;;  %s29_s16 = int_to_ptr.vmem [resolvable:$true] %s28_s16 }
   0x5   :  { %p304_p1 = scmp.lt.u32.totalorder %s300_s19, %s512_s1 }
   0x7   :  { %p306_p2 = pnand %p304_p1, %p301_p0 }
   0x9   :  { %309 = shalt.err (!%p306_p2)
}
   0xa   :  { %s310_s24 = scalar_lea.vmem %s29_s16, 2048  ;;  %p315_p4 = scmp.lt.s32.totalorder %s29_s16, %s29_s16 }
   0xb   :  { %p311_p3 = scmp.ne.s32.totalorder %s29_s16, %s310_s24  ;;  %p316_p5 = scmp.lt.s32.totalorder %s310_s24, %s310_s24 }
   0xd   :  { %p317_p6 = por %p316_p5, %p315_p4 }
   0xf   :  { %p318_p7 = pnand %p317_p6, %p311_p3 }
  0x11   :  { %321 = shalt.err (!%p318_p7)
}
  0x12   :  { %s419_s25 = smov 128   ;;  %s420_s26 = smov 8  }
  0x13   :  { %34 = dma.hbm_to_vmem [thread:$0]  %s512_s1, 2048, %s29_s16, [#allocation6], %s419_s25, %s419_s25, %s420_s26  }
  0x14   :  { %s421_s29 = smov [#allocation2]   ;;  %s422_s5 = smov [#allocation7]  }
  0x15   :  { %s19_s30 = sshll.u32 %s421_s29, 4  ;;  %s41_s6 = sshll.u32 %s422_s5, 4  ;;  %s20_s30 = int_to_ptr.vmem [resolvable:$true] %s19_s30  ;;  %s42_s6 = int_to_ptr.vmem [resolvable:$true] %s41_s6 }
  0x16   :  { %s322_s9 = scalar_lea.hbm %s511_s0, 128 }
  0x17   :  { %p323_p8 = scmp.ne.s32.totalorder %s511_s0, %s322_s9  ;;  %p326_p9 = scmp.lt.u32.totalorder %s322_s9, %s511_s0 }
  0x19   :  { %p328_p10 = pnand %p326_p9, %p323_p8 }
  0x1b   :  { %331 = shalt.err (!%p328_p10)
}
  0x1c   :  { %s332_s1 = scalar_lea.vmem %s20_s30, 128  ;;  %p337_p12 = scmp.lt.s32.totalorder %s20_s30, %s20_s30 }
  0x1d   :  { %p333_p11 = scmp.ne.s32.totalorder %s20_s30, %s332_s1  ;;  %p338_p13 = scmp.lt.s32.totalorder %s332_s1, %s332_s1 }
  0x1f   :  { %p339_p0 = por %p338_p13, %p337_p12 }
  0x21   :  { %p340_p1 = pnand %p339_p0, %p333_p11 }
  0x23   :  { %343 = shalt.err (!%p340_p1)
}
  0x24   :  { %22 = dma.hbm_to_vmem [thread:$0]  %s511_s0, 128, %s20_s30, [#allocation3]  }
  0x25   :  { %s344_s18 = scalar_lea.hbm %s513_s2, 32 }
  0x26   :  { %p345_p2 = scmp.ne.s32.totalorder %s513_s2, %s344_s18  ;;  %p348_p3 = scmp.lt.u32.totalorder %s344_s18, %s513_s2 }
  0x28   :  { %p350_p4 = pnand %p348_p3, %p345_p2 }
  0x2a   :  { %353 = shalt.err (!%p350_p4)
}
  0x2b   :  { %s354_s23 = scalar_lea.vmem %s42_s6, 32  ;;  %p359_p6 = scmp.lt.s32.totalorder %s42_s6, %s42_s6 }
  0x2c   :  { %p355_p5 = scmp.ne.s32.totalorder %s42_s6, %s354_s23  ;;  %p360_p7 = scmp.lt.s32.totalorder %s354_s23, %s354_s23 }
  0x2e   :  { %p361_p8 = por %p360_p7, %p359_p6 }
  0x30   :  { %p362_p9 = pnand %p361_p8, %p355_p5 }
  0x32   :  { %365 = shalt.err (!%p362_p9)
}
  0x33   :  { %44 = dma.hbm_to_vmem [thread:$0]  %s513_s2, 32, %s42_s6, [#allocation6]  }
  0x34   :  { %s423_s25 = smov [#allocation8]   ;;  %s366_s29 = scalar_lea.hbm %s514_s3, 128 }
  0x35   :  { %s51_s26 = sshll.u32 %s423_s25, 4  ;;  %p367_p10 = scmp.ne.s32.totalorder %s514_s3, %s366_s29  ;;  %s52_s26 = int_to_ptr.vmem [resolvable:$true] %s51_s26 }
  0x36   :  { %p370_p11 = scmp.lt.u32.totalorder %s366_s29, %s514_s3 }
  0x38   :  { %p372_p12 = pnand %p370_p11, %p367_p10 }
  0x3a   :  { %375 = shalt.err (!%p372_p12)
}
  0x3b   :  { %s376_s9 = scalar_lea.vmem %s52_s26, 128  ;;  %p381_p0 = scmp.lt.s32.totalorder %s52_s26, %s52_s26 }
  0x3c   :  { %p377_p13 = scmp.ne.s32.totalorder %s52_s26, %s376_s9  ;;  %p382_p1 = scmp.lt.s32.totalorder %s376_s9, %s376_s9 }
  0x3e   :  { %p383_p2 = por %p382_p1, %p381_p0 }
  0x40   :  { %p384_p3 = pnand %p383_p2, %p377_p13 }
  0x42   :  { %387 = shalt.err (!%p384_p3)
}
  0x43   :  { %54 = dma.hbm_to_vmem [thread:$0]  %s514_s3, 128, %s52_s26, [#allocation9]  }
  0x44   :  { %410 = dma.done.wait [#allocation3], 128  }
  0x45   :  { %411 = vsyncadd [#allocation3], 4294967168 }
  0x46   :  { %412 = dma.done.wait [#allocation6], 2080  }
  0x47   :  { %413 = vsyncadd [#allocation6], 4294965216 }
  0x48   :  { %414 = dma.done.wait [#allocation9], 128  }
  0x49   :  { %415 = vsyncadd [#allocation9], 4294967168  ;;  %v424_v0 = vmov 0   ;;  %v272_v1 = vld [vmem:[#allocation5 + $0x4] ss:$8 sps:$4 sm:$0xff]   ;;  %v68_v17 = vld [vmem:[#allocation2] sm:$0xff]  ;;  %v88_v19 = vlaneseq }
  0x4a   :  { %210 = vmatprep.mubr.bf16.mxu0 %v424_v0  ;;  %v274_v2 = vld [vmem:[#allocation5] ss:$8 sps:$4 sm:$0xff]   ;;  %178 = vmatprep.subr.bf16.mxu0 %v272_v1  ;;  %v275_v3 = vld [vmem:[#allocation5 + $0x14] ss:$8 sps:$4 sm:$0xff]   ;;  %v277_v4 = vld [vmem:[#allocation5 + $0x10] ss:$8 sps:$4 sm:$0xff]   ;;  %v69_v18 = vpack.c.bf16 %v68_v17, %v68_v17 }
  0x4b   :  { %179 = vmatpush1.bf16.msra.mxu0 %v274_v2  ;;  %v278_v5 = vld [vmem:[#allocation5 + $0x24] ss:$8 sps:$4 sm:$0xff]   ;;  %v280_v6 = vld [vmem:[#allocation5 + $0x20] ss:$8 sps:$4 sm:$0xff]   ;;  %v281_v7 = vld [vmem:[#allocation5 + $0x34] ss:$8 sps:$4 sm:$0xff]  }
  0x4c   :  { %180 = vmatprep.subr.bf16.mxu0 %v275_v3  ;;  %v283_v8 = vld [vmem:[#allocation5 + $0x30] ss:$8 sps:$4 sm:$0xff]   ;;  %v284_v9 = vld [vmem:[#allocation5 + $0x44] ss:$8 sps:$4 sm:$0xff]   ;;  %v286_v10 = vld [vmem:[#allocation5 + $0x40] ss:$8 sps:$4 sm:$0xff]  }
  0x4d   :  { %v287_v11 = vld [vmem:[#allocation5 + $0x54] ss:$8 sps:$4 sm:$0xff]   ;;  %v289_v12 = vld [vmem:[#allocation5 + $0x50] ss:$8 sps:$4 sm:$0xff]   ;;  %v290_v13 = vld [vmem:[#allocation5 + $0x64] ss:$8 sps:$4 sm:$0xff]  }
  0x4e   :  { %v292_v14 = vld [vmem:[#allocation5 + $0x60] ss:$8 sps:$4 sm:$0xff]   ;;  %v293_v15 = vld [vmem:[#allocation5 + $0x74] ss:$8 sps:$4 sm:$0xff]   ;;  %v295_v16 = vld [vmem:[#allocation5 + $0x70] ss:$8 sps:$4 sm:$0xff]  }
  0x4f   :  { %181 = vmatpush1.bf16.msra.mxu0 %v277_v4  ;;  %v89_v20 = vshrl.u32 %v88_v19, 7  ;;  %v86_v22 = vld [vmem:[#allocation7] sm:$0x3]  ;;  %s425_s3 = smov [#allocation10]  }
  0x50   :  { %182 = vmatprep.subr.bf16.mxu0 %v278_v5  ;;  %s236_s10 = sshll.u32 %s425_s3, 4  ;;  %s237_s10 = int_to_ptr.vmem [resolvable:$true] %s236_s10 }
  0x51   :  { %v94_v21 = vsub.s32 1, %v89_v20  ;;  %v90_v30 = vsub.s32 0, %v89_v20  ;;  %s388_s11 = scalar_lea.vmem %s237_s10, 128  ;;  %p393_p5 = scmp.lt.s32.totalorder %s237_s10, %s237_s10 }
  0x52   :  { %p389_p4 = scmp.ne.s32.totalorder %s237_s10, %s388_s11  ;;  %p394_p6 = scmp.lt.s32.totalorder %s388_s11, %s388_s11 }
  0x53   :  { %183 = vmatpush1.bf16.msra.mxu0 %v280_v6  ;;  %v95_v23 = vrot.slane %v86_v22, %v94_v21  ;;  %v91_v32 = vrot.slane %v86_v22, %v90_v30 }
  0x54   :  { %184 = vmatprep.subr.bf16.mxu0 %v281_v7  ;;  %p395_p7 = por %p394_p6, %p393_p5 }
  0x56   :  { %p396_p8 = pnand %p395_p7, %p389_p4 }
  0x57   :  { %185 = vmatpush1.bf16.msra.mxu0 %v283_v8 }
  0x58   :  { %186 = vmatprep.subr.bf16.mxu0 %v284_v9 }
  0x5b   :  { %187 = vmatpush1.bf16.msra.mxu0 %v286_v10 }
  0x5c   :  { %188 = vmatprep.subr.bf16.mxu0 %v287_v11 }
  0x5f   :  { %189 = vmatpush1.bf16.msra.mxu0 %v289_v12 }
  0x60   :  { %190 = vmatprep.subr.bf16.mxu0 %v290_v13 }
  0x63   :  { %191 = vmatpush1.bf16.msra.mxu0 %v292_v14 }
  0x64   :  { %192 = vmatprep.subr.bf16.mxu0 %v293_v15 }
  0x67   :  { %193 = vmatpush1.bf16.msra.mxu0 %v295_v16 }
  0x6a   :  { %211 = vmatmul.mubr.bf16.vlgmr.msra.gmra.mrb[0].mxu0 %v69_v18 }
 0x13d   :  { %v212_v24 = vpop.f32.mrb[0].mxu0 }
 0x13e   :  { %v214_v25 = vpop.f32.mrb[1].mxu0  ;;  %v213_v34 = vadd.f32 %v212_v24, %v91_v32 }
 0x13f   :  { %v215_v26 = vadd.f32 %v214_v25, %v95_v23  ;;  %v216_v27 = vpop.f32.mrb[2].mxu0 }
 0x140   :  { %v217_v28 = vpop.f32.mrb[3].mxu0  ;;  %v219_v35 = vmax.f32 %v213_v34, 0.0 }
 0x141   :  { %v263_v29 = vmul.f32 -1.442695, %v215_v26 }
 0x142   :  { %v226_v36 = vsub.f32 %v219_v35, %v68_v17 }
 0x143   :  { %296 = vpow2.f32 %v263_v29 }
 0x14d   :  { %v297_v31 = vpop.eup %296 }
 0x14e   :  { %v223_v33 = vadd.f32 1.0, %v297_v31 }
 0x150   :  { %298 = vrcp.f32 %v223_v33 }
 0x15a   :  { %v299_v37 = vpop.eup %298 }
 0x15b   :  { %v227_v38 = vmul.f32 %v299_v37, %v226_v36 }
 0x15d   :  { %v228_v39 = vadd.f32 %v227_v38, %v68_v17 }
 0x15f   :  { %229 = vst [vmem:[#allocation10] sm:$0xff] %v228_v39 }
 0x160   :  { %399 = shalt.err (!%p396_p8)
}
 0x161   :  { %s400_s1 = scalar_lea.hbm %s515_s4, 128 }
 0x162   :  { %p401_p9 = scmp.ne.s32.totalorder %s515_s4, %s400_s1  ;;  %p404_p10 = scmp.lt.u32.totalorder %s400_s1, %s515_s4 }
 0x164   :  { %p406_p11 = pnand %p404_p10, %p401_p9 }
 0x166   :  { %409 = shalt.err (!%p406_p11)
}
 0x167   :  { %239 = dma.vmem_to_hbm [thread:$0]  %s237_s10, 128, %s515_s4, [#allocation4]  }
 0x168   :  { %416 = dma.done.wait [#allocation4], 128  }
 0x169   :  { %417 = vsyncadd [#allocation4], 4294967168 }
 0x16a   :  { %243 = vsyncpa [#allocation3], 1 }
 0x16b   :  { %244 = vsyncpa [#allocation6], 1 }
 0x16c   :  { %245 = vsyncpa [#allocation9], 1 }
 0x16d   :  { %246 = vsyncpa [#allocation4], 1 }

</bundles_post_ra>
